<compile_context>
chip_gen: v6e
topology: v6e:2x2x1
jax: 0.10.0
libtpu: 0.0.40
codegen_flags: <defaults>
</compile_context>

<pallas_src>
import functools

import jax
import jax.numpy as jnp
from jax.experimental import pallas as pl
from jax.experimental.pallas import tpu as pltpu

IGNORE_INDEX = -100

# ---------------- problem sizes (small, deterministic) ----------------
B = 2          # batch
F = 4          # feature_dim (parallel token streams)
T = 9          # raw sequence length (loss path trains on T-1 = 8)
D = 32         # embedding / model dim
V = 128        # num_tokens (vocab) -> exactly one vreg lane width


# ---------------- Pallas kernels (single grid step each) ----------------
def _logits_kernel(tok_ref, table_ref, out_ref):
    """Single fused-table gather-as-matmul: logits = onehot(tok) @ table."""
    n = tok_ref.shape[0]
    v = table_ref.shape[0]
    tok = tok_ref[...]                                             # (n, 1) int32
    col = jax.lax.broadcasted_iota(jnp.int32, (n, v), 1)
    onehot = (col == tok).astype(jnp.bfloat16)                     # (n, V) bf16 (exact)
    out_ref[...] = jnp.dot(onehot, table_ref[...],
                           preferred_element_type=jnp.float32)     # (n, V) f32 lane-dense


def _ce_kernel(tok_tgt_ref, table_ref, loss_ref):
    """Fused table matmul + mean cross-entropy with ignore_index.

    tok_tgt_ref: (n, 2) int32 — column 0 = input token, column 1 = target.
    loss_ref:    (1,) f32 in SMEM.
    """
    n = tok_tgt_ref.shape[0]
    v = table_ref.shape[0]
    tok_tgt = tok_tgt_ref[...]                                     # (n, 2) int32
    tok = tok_tgt[:, 0:1]                                          # (n, 1)
    tgt = tok_tgt[:, 1:2]                                          # (n, 1)

    col = jax.lax.broadcasted_iota(jnp.int32, (n, v), 1)
    onehot = (col == tok).astype(jnp.bfloat16)                     # (n, V) bf16
    logits = jnp.dot(onehot, table_ref[...],
                     preferred_element_type=jnp.float32)           # (n, V) f32

    row_max = jnp.max(logits, axis=-1, keepdims=True)
    lse = row_max + jnp.log(jnp.sum(jnp.exp(logits - row_max),
                                    axis=-1, keepdims=True))       # (n, 1)
    tgt_logit = jnp.sum(jnp.where(col == tgt, logits, 0.0),
                        axis=-1, keepdims=True)                    # (n, 1)

    valid = (tgt != IGNORE_INDEX)
    per_row = jnp.where(valid, lse - tgt_logit, 0.0)               # (n, 1)

    loss_sum = jnp.sum(per_row, axis=0, keepdims=True)             # (1, 1)
    cnt = jnp.sum(valid.astype(jnp.float32), axis=0, keepdims=True)
    # NOTE: cnt == 0 (every target == ignore_index) divides by zero -> NaN/Inf,
    # matching F.cross_entropy / the pure-JAX reference semantics.
    loss_vec = loss_sum * pl.reciprocal(cnt, approx=True)          # EUP divide
    loss_ref[0] = jnp.sum(loss_vec)                                # scalar -> SMEM


# ---------------- wrappers around pallas_call ----------------
def _logits_pallas(tok_flat, table_bf16):
    """tok_flat: (N, 1) int32, table: (V, V) bf16 -> logits (N, V) f32."""
    n = tok_flat.shape[0]
    v = table_bf16.shape[0]
    return pl.pallas_call(
        _logits_kernel,
        out_shape=jax.ShapeDtypeStruct((n, v), jnp.float32),
        grid=(1,),
        in_specs=[
            pl.BlockSpec((n, 1), lambda i: (0, 0)),   # tiny; fine at grid=(1,)
            pl.BlockSpec((v, v), lambda i: (0, 0)),   # fused bf16 logits table
        ],
        out_specs=pl.BlockSpec((n, v), lambda i: (0, 0)),
        compiler_params=pltpu.CompilerParams(
            dimension_semantics=("arbitrary",)),
    )(tok_flat, table_bf16)


def _ce_loss_pallas(tok_tgt, table_bf16):
    """tok_tgt: (N, 2) int32 (input tok, target) -> scalar mean CE loss."""
    n = tok_tgt.shape[0]
    v = table_bf16.shape[0]
    loss = pl.pallas_call(
        _ce_kernel,
        out_shape=jax.ShapeDtypeStruct((1,), jnp.float32),
        grid=(1,),
        in_specs=[
            pl.BlockSpec((n, 2), lambda i: (0, 0)),
            pl.BlockSpec((v, v), lambda i: (0, 0)),
        ],
        out_specs=pl.BlockSpec(memory_space=pltpu.MemorySpace.SMEM),
        compiler_params=pltpu.CompilerParams(
            dimension_semantics=("arbitrary",)),
    )(tok_tgt, table_bf16)
    return loss[0]


# ---------------- AutoregressiveWrapper forward ----------------
def init_params(key):
    k1, k2, k3 = jax.random.split(key, 3)
    embed = jax.random.normal(k1, (V, D), jnp.float32) * 0.02
    w_out = jax.random.normal(k2, (D, V), jnp.float32) * 0.02
    b_out = jax.random.normal(k3, (1, V), jnp.float32) * 0.01
    return {"embed": embed, "w_out": w_out, "b_out": b_out}


def _fused_table(params):
    """Parameter-only fold of embedding + head: table[v] = embed[v] @ W + b.

    Computed once outside the kernel (it depends only on weights), cast to bf16
    so the in-kernel MXU matmul runs at native bf16 cadence.
    """
    table = params["embed"] @ params["w_out"] + params["b_out"]    # (V, V) f32
    return table.astype(jnp.bfloat16)


def _net_logits(params, tokens):
    """Synthetic inner net.  tokens: (b, f, t) int32 -> logits (b, f, t, V)."""
    b, f, t = tokens.shape
    tok_flat = tokens.reshape(-1, 1).astype(jnp.int32)             # (N, 1)
    logits_flat = _logits_pallas(tok_flat, _fused_table(params))
    return logits_flat.reshape(b, f, t, V)                         # class-last, lane-dense


@functools.partial(jax.jit, static_argnames=("return_loss",))
def autoregressive_wrapper_forward(params, x, return_loss=False):
    """x: int32 token ids of shape (b, feature_dim, t)."""
    if not return_loss:
        return _net_logits(params, x)

    xi = x[:, :, :-1]                                              # (b, f, t-1)
    xo = x[:, :, 1:]                                               # (b, f, t-1)
    # merge input tokens + targets into one (N, 2) block -> one DMA, not two
    tok_tgt = jnp.stack(
        [xi.reshape(-1), xo.reshape(-1)], axis=-1).astype(jnp.int32)  # (N, 2)
    # fused gather + head + cross_entropy(ignore_index=-100, reduction='mean')
    return _ce_loss_pallas(tok_tgt, _fused_table(params))


# ---------------- pure-JAX references (for verification, full f32) ----------------
def _reference_loss(params, x):
    xi = x[:, :, :-1]
    xo = x[:, :, 1:]
    emb = params["embed"][xi]                                      # (b, f, s, D)
    logits = emb @ params["w_out"] + params["b_out"][0]            # (b, f, s, V)
    lse = jax.scipy.special.logsumexp(logits, axis=-1)
    tgt_logit = jnp.take_along_axis(logits, xo[..., None], axis=-1)[..., 0]
    valid = xo != IGNORE_INDEX
    per = jnp.where(valid, lse - tgt_logit, 0.0)
    return per.sum() / valid.sum()


def _reference_logits(params, x):
    emb = params["embed"][x]                                       # (b, f, t, D)
    return emb @ params["w_out"] + params["b_out"][0]              # (b, f, t, V)


if __name__ == "__main__":
    key = jax.random.PRNGKey(0)
    kp, kx = jax.random.split(key)
    params = init_params(kp)
    x = jax.random.randint(kx, (B, F, T), 0, V, dtype=jnp.int32)

    # loss path (return_loss=True)
    loss = jax.block_until_ready(
        autoregressive_wrapper_forward(params, x, return_loss=True))

    # logits path (return_loss=False)
    logits = jax.block_until_ready(
        autoregressive_wrapper_forward(params, x, return_loss=False))
    assert logits.shape == (B, F, T, V)

    # bf16 fused table + approx reciprocal => compare against the f32 reference
    # with a correspondingly looser tolerance (gather/one-hot itself is exact).
    ref_loss = _reference_loss(params, x)
    ref_logits = _reference_logits(params, x)
    assert jnp.allclose(loss, ref_loss, rtol=1e-2, atol=1e-2), (loss, ref_loss)
    assert jnp.allclose(logits, ref_logits, rtol=1e-2, atol=1e-2)

    print("KERNEL_OK")
</pallas_src>

<mosaic_0001>
module attributes {stable_mosaic.version = 11 : i64} {
  func.func @_ce_kernel(%arg0: i32, %arg1: memref<64x2xi32, #tpu.memory_space<vmem>>, %arg2: memref<128x128xbf16, #tpu.memory_space<vmem>>, %arg3: memref<1xf32, #tpu.memory_space<smem>>) attributes {dimension_semantics = [#tpu.dimension_semantics<arbitrary>], iteration_bounds = array<i64: 1>, scalar_prefetch = 0 : i64, scratch_operands = 0 : i64, tpu.core_type = #tpu.core_type<tc>, window_params = [{pipeline_mode = #tpu.pipeline_mode<synchronous>, transform_indices = @transform_0, window_bounds = array<i64: 64, 2>}, {pipeline_mode = #tpu.pipeline_mode<synchronous>, transform_indices = @transform_1, window_bounds = array<i64: 128, 128>}, {transform_indices = @transform_2, window_bounds = array<i64: 1>}]} {
    %c0 = arith.constant 0 : index
    %c0_0 = arith.constant 0 : index
    %0 = vector.load %arg1[%c0, %c0_0] : memref<64x2xi32, #tpu.memory_space<vmem>>, vector<64x2xi32>
    %1 = vector.extract_strided_slice %0 {offsets = [0, 0], sizes = [64, 1], strides = [1, 1]} : vector<64x2xi32> to vector<64x1xi32>
    %2 = vector.extract_strided_slice %0 {offsets = [0, 1], sizes = [64, 1], strides = [1, 1]} : vector<64x2xi32> to vector<64x1xi32>
    %3 = tpu.iota {dimensions = array<i32: 1>} : vector<64x128xi32>
    %4 = vector.broadcast %1 : vector<64x1xi32> to vector<64x128xi32>
    %5 = arith.cmpi eq, %3, %4 : vector<64x128xi32>
    %6 = arith.extui %5 : vector<64x128xi1> to vector<64x128xi32>
    %7 = arith.sitofp %6 : vector<64x128xi32> to vector<64x128xf32>
    %8 = arith.truncf %7 : vector<64x128xf32> to vector<64x128xbf16>
    %c0_1 = arith.constant 0 : index
    %c0_2 = arith.constant 0 : index
    %9 = vector.load %arg2[%c0_1, %c0_2] : memref<128x128xbf16, #tpu.memory_space<vmem>>, vector<128x128xbf16>
    %cst = arith.constant dense<0.000000e+00> : vector<64x128xf32>
    %10 = tpu.matmul %8, %9, %cst {dimension_numbers = #tpu.dot_dimension_numbers<[1], [0], [0], [1], [0, 0, 1, 1], [], []>} : vector<64x128xbf16>, vector<128x128xbf16>, vector<64x128xf32> -> vector<64x128xf32>
    %cst_3 = arith.constant dense<0xFF800000> : vector<64xf32>
    %11 = vector.multi_reduction <maximumf>, %10, %cst_3 [1] : vector<64x128xf32> to vector<64xf32>
    %12 = vector.shape_cast %11 : vector<64xf32> to vector<64x1xf32>
    %13 = vector.broadcast %12 : vector<64x1xf32> to vector<64x128xf32>
    %14 = arith.subf %10, %13 : vector<64x128xf32>
    %15 = math.exp %14 : vector<64x128xf32>
    %cst_4 = arith.constant dense<0.000000e+00> : vector<64xf32>
    %16 = vector.multi_reduction <add>, %15, %cst_4 [1] : vector<64x128xf32> to vector<64xf32>
    %17 = vector.shape_cast %16 : vector<64xf32> to vector<64x1xf32>
    %18 = math.log %17 : vector<64x1xf32>
    %19 = arith.addf %12, %18 : vector<64x1xf32>
    %20 = vector.broadcast %2 : vector<64x1xi32> to vector<64x128xi32>
    %21 = arith.cmpi eq, %3, %20 : vector<64x128xi32>
    %cst_5 = arith.constant 0.000000e+00 : f32
    %22 = vector.broadcast %cst_5 : f32 to vector<64x128xf32>
    %23 = arith.select %21, %10, %22 : vector<64x128xi1>, vector<64x128xf32>
    %cst_6 = arith.constant dense<0.000000e+00> : vector<64xf32>
    %24 = vector.multi_reduction <add>, %23, %cst_6 [1] : vector<64x128xf32> to vector<64xf32>
    %25 = vector.shape_cast %24 : vector<64xf32> to vector<64x1xf32>
    %c-100_i32 = arith.constant -100 : i32
    %26 = vector.broadcast %c-100_i32 : i32 to vector<64x1xi32>
    %27 = arith.cmpi ne, %2, %26 : vector<64x1xi32>
    %28 = arith.subf %19, %25 : vector<64x1xf32>
    %cst_7 = arith.constant 0.000000e+00 : f32
    %29 = vector.broadcast %cst_7 : f32 to vector<64x1xf32>
    %30 = arith.select %27, %28, %29 : vector<64x1xi1>, vector<64x1xf32>
    %cst_8 = arith.constant dense<0.000000e+00> : vector<1xf32>
    %31 = vector.multi_reduction <add>, %30, %cst_8 [0] : vector<64x1xf32> to vector<1xf32>
    %32 = vector.shape_cast %31 : vector<1xf32> to vector<1x1xf32>
    %33 = arith.extui %27 : vector<64x1xi1> to vector<64x1xi32>
    %34 = arith.sitofp %33 : vector<64x1xi32> to vector<64x1xf32>
    %cst_9 = arith.constant dense<0.000000e+00> : vector<1xf32>
    %35 = vector.multi_reduction <add>, %34, %cst_9 [0] : vector<64x1xf32> to vector<1xf32>
    %36 = vector.shape_cast %35 : vector<1xf32> to vector<1x1xf32>
    %37 = tpu.reciprocal %36 {approx = true} : vector<1x1xf32> -> vector<1x1xf32>
    %38 = arith.mulf %32, %37 : vector<1x1xf32>
    %39 = vector.shape_cast %38 : vector<1x1xf32> to vector<1x1x1xf32>
    %cst_10 = arith.constant dense<0.000000e+00> : vector<1xf32>
    %40 = vector.multi_reduction <add>, %39, %cst_10 [1, 2] : vector<1x1x1xf32> to vector<1xf32>
    %41 = vector.shape_cast %40 : vector<1xf32> to vector<1x1x1xf32>
    %42 = vector.extract %41[0, 0, 0] : f32 from vector<1x1x1xf32>
    %c0_11 = arith.constant 0 : index
    %43 = memref.load %arg3[%c0_11] : memref<1xf32, #tpu.memory_space<smem>>
    memref.store %42, %arg3[%c0_11] : memref<1xf32, #tpu.memory_space<smem>>
    return
  }
  func.func @transform_0(%arg0: i32) -> (i32, i32) {
    %c0_i32 = arith.constant 0 : i32
    %c0_i32_0 = arith.constant 0 : i32
    %c0_i32_1 = arith.constant 0 : i32
    return %c0_i32, %c0_i32_0 : i32, i32
  }
  func.func @transform_1(%arg0: i32) -> (i32, i32) {
    %c0_i32 = arith.constant 0 : i32
    %c0_i32_0 = arith.constant 0 : i32
    %c0_i32_1 = arith.constant 0 : i32
    return %c0_i32, %c0_i32_0 : i32, i32
  }
  func.func @transform_2(%arg0: i32) -> i32 {
    %c0_i32 = arith.constant 0 : i32
    %c0_i32_0 = arith.constant 0 : i32
    return %c0_i32 : i32
  }
}

</mosaic_0001>

<bundles_post_ra>
// kernel: autoregressive_wrapper_forward.1
= control target key start
LH: loop header
LB: loop body
LE: loop exit
PB: predicated region body
PF: predicated region fallthrough
CT: control target
= control target key end

     0   :  { %v594_v2 = vmov 0   ;;  %s844_s0 = inlined_call_operand.vmem [shape: s32[64,2], index: 0, kind: input, shape index: {}]   ;;  %s845_s1 = inlined_call_operand.vmem [shape: bf16[128,128], index: 1, kind: input, shape index: {}]   ;;  %s846_s2 = inlined_call_operand.hbm [shape: f32[1], index: 2, kind: output, shape index: {}]  }
   0x1   :  { %v618_v0 = vld [vmem:[%s844_s0 + $0x10] sm:$0xff]  ;;  %v623_v1 = vld [vmem:[%s844_s0] sm:$0xff]  ;;  %539 = vset.pattern.permute.xlu1 %v594_v2  ;;  %538 = vset.pattern.permute.xlu0 %v594_v2  ;;  %v630_v3 = vld [vmem:[%s844_s0 + $0x18] sm:$0xff] }
   0x2   :  { %30 = vperm.xlu1 %539, %v618_v0   ;;  %24 = vperm.xlu0 %538, %v623_v1   ;;  %v635_v4 = vld [vmem:[%s844_s0 + $0x8] sm:$0xff]  ;;  %v542_v5 = vld [vmem:[%s845_s1 + $0x38] sm:$0xff]   ;;  %v543_v6 = vld [vmem:[%s845_s1 + $0x30] sm:$0xff]  }
   0x3   :  { %490 = vmatprep.subr.bf16.mxu0 %v542_v5  ;;  %514 = vmatprep.subr.bf16.mxu1 %v542_v5  ;;  %v648_v7 = vld [vmem:[%s844_s0 + $0x28] sm:$0xff]  ;;  %v653_v8 = vld [vmem:[%s844_s0 + $0x20] sm:$0xff]  ;;  %v663_v10 = vld [vmem:[%s844_s0 + $0x38] sm:$0xff] }
   0x4   :  { %491 = vmatpush3.bf16.msra.mxu0 %v542_v5  ;;  %522 = vmatpush3.bf16.msra.mxu1 %v542_v5  ;;  %v544_v9 = vld [vmem:[%s845_s1 + $0x28] sm:$0xff]   ;;  %v668_v11 = vld [vmem:[%s844_s0 + $0x30] sm:$0xff] }
   0x5   :  { %492 = vmatprep.subr.bf16.mxu0 %v543_v6  ;;  %515 = vmatprep.subr.bf16.mxu1 %v543_v6 }
   0x6   :  { %33 = vperm.xlu1 %539, %v630_v3   ;;  %27 = vperm.xlu0 %538, %v635_v4  }
   0x8   :  { %493 = vmatpush3.bf16.msra.mxu0 %v543_v6  ;;  %523 = vmatpush3.bf16.msra.mxu1 %v543_v6 }
   0xa   :  { %39 = vperm.xlu1 %539, %v648_v7   ;;  %36 = vperm.xlu0 %538, %v653_v8  }
   0xb   :  { %7 = vsyncpa [#allocation3], 0  ;;  %494 = vmatprep.subr.bf16.mxu0 %v544_v9  ;;  %v545_v12 = vld [vmem:[%s845_s1 + $0x20] sm:$0xff]   ;;  %516 = vmatprep.subr.bf16.mxu1 %v544_v9  ;;  %v546_v13 = vld [vmem:[%s845_s1 + $0x18] sm:$0xff]   ;;  %v21_v17 = vlaneseq  ;;  %v595_v23 = vmov 1.0|1.0  }
   0xc   :  { %495 = vmatpush3.bf16.msra.mxu0 %v544_v9  ;;  %524 = vmatpush3.bf16.msra.mxu1 %v544_v9  ;;  %v547_v14 = vld [vmem:[%s845_s1 + $0x10] sm:$0xff]   ;;  %v548_v15 = vld [vmem:[%s845_s1 + $0x8] sm:$0xff]   ;;  %v549_v16 = vld [vmem:[%s845_s1] sm:$0xff]   ;;  %v596_v28 = vmov 1   ;;  %s598_s1 = smov 127   ;;  %s599_s13 = smov [#allocation2]  }
   0xd   :  { %496 = vmatprep.subr.bf16.mxu0 %v545_v12  ;;  %517 = vmatprep.subr.bf16.mxu1 %v545_v12  ;;  %v687_v20 = vand.u32 127, %v21_v17 }
   0xe   :  { %45 = vperm.xlu1 %539, %v663_v10   ;;  %42 = vperm.xlu0 %538, %v668_v11  }
  0x10   :  { %497 = vmatpush3.bf16.msra.mxu0 %v545_v12  ;;  %525 = vmatpush3.bf16.msra.mxu1 %v545_v12 }
  0x11   :  { %498 = vmatprep.subr.bf16.mxu0 %v546_v13  ;;  %518 = vmatprep.subr.bf16.mxu1 %v546_v13 }
  0x12   :  { %540 = vset.pattern.permute.xlu1 %v596_v28  ;;  %541 = vset.pattern.permute.xlu0 %v596_v28 }
  0x14   :  { %499 = vmatpush3.bf16.msra.mxu0 %v546_v13  ;;  %526 = vmatpush3.bf16.msra.mxu1 %v546_v13 }
  0x15   :  { %500 = vmatprep.subr.bf16.mxu0 %v547_v14  ;;  %519 = vmatprep.subr.bf16.mxu1 %v547_v14 }
  0x18   :  { %501 = vmatpush3.bf16.msra.mxu0 %v547_v14  ;;  %527 = vmatpush3.bf16.msra.mxu1 %v547_v14 }
  0x19   :  { %502 = vmatprep.subr.bf16.mxu0 %v548_v15  ;;  %520 = vmatprep.subr.bf16.mxu1 %v548_v15 }
  0x1c   :  { %503 = vmatpush3.bf16.msra.mxu0 %v548_v15  ;;  %528 = vmatpush3.bf16.msra.mxu1 %v548_v15 }
  0x1d   :  { %504 = vmatprep.subr.bf16.mxu0 %v549_v16  ;;  %521 = vmatprep.subr.bf16.mxu1 %v549_v16 }
  0x20   :  { %505 = vmatpush3.bf16.msra.mxu0 %v549_v16  ;;  %529 = vmatpush3.bf16.msra.mxu1 %v549_v16 }
  0x7d   :  { %v31_v18 = vpop.permute.xlu1 %30  ;;  %v25_v19 = vpop.permute.xlu0 %24 }
  0x7e   :  { %vm49_vm0 = vcmp.eq.s32.totalorder %v687_v20, %v31_v18  ;;  %vm47_vm3 = vcmp.eq.s32.totalorder %v687_v20, %v25_v19 }
  0x81   :  { %v34_v21 = vpop.permute.xlu1 %33  ;;  %v28_v22 = vpop.permute.xlu0 %27 }
  0x82   :  { %vm50_vm1 = vcmp.eq.s32.totalorder %v687_v20, %v34_v21  ;;  %vm48_vm2 = vcmp.eq.s32.totalorder %v687_v20, %v28_v22 }
  0x83   :  { %vm464_vm4 = vmpackc.low %vm50_vm1, %vm49_vm0 }
  0x84   :  { %vm462_vm5 = vmpackc.low %vm48_vm2, %vm47_vm3 }
  0x85   :  { %506 = vmatprep.mubr.msk.bf16.mxu0 %vm462_vm5, %v595_v23  ;;  %v40_v24 = vpop.permute.xlu1 %39  ;;  %v37_v25 = vpop.permute.xlu0 %36  ;;  %vm341_vm5 = vcmp.ne.s32.totalorder %v635_v4, 4294967196 }
  0x86   :  { %vm52_vm6 = vcmp.eq.s32.totalorder %v687_v20, %v40_v24  ;;  %507 = vmatmul.mubr.msk.bf16.vlgmr.msra.gmra.mxu0 %vm464_vm4, %v595_v23  ;;  %vm51_vm7 = vcmp.eq.s32.totalorder %v687_v20, %v37_v25  ;;  %vm340_vm4 = vcmp.ne.s32.totalorder %v623_v1, 4294967196 }
  0x87   :  { %vm466_vm8 = vmpackc.low %vm52_vm6, %vm51_vm7  ;;  %vm364_vm6 = vcmask 15368   ;;  %vm342_vm7 = vcmp.ne.s32.totalorder %v618_v0, 4294967196 }
  0x88   :  { %510 = vmatprep.mubr.msk.bf16.mxu1 %vm466_vm8, %v595_v23  ;;  %vm343_vm8 = vcmp.ne.s32.totalorder %v630_v3, 4294967196 }
  0x89   :  { %v46_v26 = vpop.permute.xlu1 %45  ;;  %v43_v27 = vpop.permute.xlu0 %42 }
  0x8a   :  { %vm54_vm9 = vcmp.eq.s32.totalorder %v687_v20, %v46_v26  ;;  %vm53_vm10 = vcmp.eq.s32.totalorder %v687_v20, %v43_v27 }
  0x8b   :  { %vm468_vm11 = vmpackc.low %vm54_vm9, %vm53_vm10  ;;  %vm344_vm9 = vcmp.ne.s32.totalorder %v653_v8, 4294967196  ;;  %vm345_vm10 = vcmp.ne.s32.totalorder %v648_v7, 4294967196 }
  0x8c   :  { %511 = vmatmul.mubr.msk.bf16.vlgmr.msra.gmra.mxu1 %vm468_vm11, %v595_v23  ;;  %vm346_vm11 = vcmp.ne.s32.totalorder %v668_v11, 4294967196 }
 0x146   :  { %v697_v29 = vpop.f32.mrf.mxu0 }
 0x147   :  { %208 = vmax.xlane.f32.xlu0 %v697_v29 }
 0x148   :  { %v700_v30 = vpop.f32.mrf.mxu0 }
 0x14a   :  { %v706_v32 = vpop.f32.mrf.mxu0 }
 0x14b   :  { %204 = vmax.xlane.f32.xlu0 %v700_v30 }
 0x14c   :  { %v703_v31 = vpop.f32.mrf.mxu1  ;;  %v717_v36 = vpop.f32.mrf.mxu0 }
 0x14d   :  { %216 = vmax.xlane.f32.xlu1 %v703_v31 }
 0x14e   :  { %v708_v33 = vpop.f32.mrf.mxu1 }
 0x14f   :  { %210 = vmax.xlane.f32.xlu0 %v706_v32 }
 0x150   :  { %v711_v34 = vpop.f32.mrf.mxu1 }
 0x151   :  { %212 = vmax.xlane.f32.xlu1 %v708_v33 }
 0x152   :  { %v714_v35 = vpop.f32.mrf.mxu1 }
 0x153   :  { %214 = vmax.xlane.f32.xlu0 %v714_v35 }
 0x155   :  { %206 = vmax.xlane.f32.xlu1 %v717_v36 }
 0x157   :  { %218 = vmax.xlane.f32.xlu0 %v711_v34 }
 0x166   :  { %285 = vperm.xlu1 %540, %v623_v1  }
 0x16a   :  { %291 = vperm.xlu1 %540, %v618_v0  }
 0x16d   :  { %288 = vperm.xlu0 %541, %v635_v4  }
 0x16e   :  { %294 = vperm.xlu1 %540, %v630_v3  }
 0x172   :  { %297 = vperm.xlu1 %540, %v653_v8  }
 0x176   :  { %300 = vperm.xlu1 %540, %v648_v7  }
 0x17a   :  { %303 = vperm.xlu1 %540, %v668_v11  }
 0x17e   :  { %306 = vperm.xlu1 %540, %v663_v10  }
 0x1d0   :  { %v729_v37 = vpop.xlane.xlu0 %208 }
 0x1d1   :  { %v222_v39 = vsub.f32 %v697_v29, %v729_v37 }
 0x1d3   :  { %v232_v44 = vmul.f32 1.442695, %v222_v39 }
 0x1d4   :  { %v731_v38 = vpop.xlane.xlu0 %204 }
 0x1d5   :  { %v220_v40 = vsub.f32 %v700_v30, %v731_v38 }
 0x1d6   :  { %v737_v41 = vpop.xlane.xlu1 %216 }
 0x1d7   :  { %v228_v42 = vmul.f32 1.442695, %v220_v40  ;;  %v226_v47 = vsub.f32 %v703_v31, %v737_v41 }
 0x1d8   :  { %v739_v43 = vpop.xlane.xlu0 %210 }
 0x1d9   :  { %550 = vpow2.f32 %v228_v42  ;;  %v223_v51 = vsub.f32 %v706_v32, %v739_v43  ;;  %v240_v53 = vmul.f32 1.442695, %v226_v47 }
 0x1da   :  { %v741_v45 = vpop.xlane.xlu1 %212  ;;  %552 = vpow2.f32 %v232_v44 }
 0x1db   :  { %v224_v46 = vsub.f32 %v708_v33, %v741_v45  ;;  %v234_v56 = vmul.f32 1.442695, %v223_v51 }
 0x1dc   :  { %v747_v49 = vpop.xlane.xlu0 %214 }
 0x1dd   :  { %v236_v48 = vmul.f32 1.442695, %v224_v46  ;;  %v225_v57 = vsub.f32 %v714_v35, %v747_v49 }
 0x1de   :  { %v749_v50 = vpop.xlane.xlu1 %206 }
 0x1df   :  { %554 = vpow2.f32 %v236_v48  ;;  %v221_v52 = vsub.f32 %v717_v36, %v749_v50  ;;  %v238_v61 = vmul.f32 1.442695, %v225_v57 }
 0x1e0   :  { %v757_v58 = vpop.xlane.xlu0 %218 }
 0x1e1   :  { %v230_v54 = vmul.f32 1.442695, %v221_v52  ;;  %v227_v62 = vsub.f32 %v711_v34, %v757_v58 }
 0x1e2   :  { %v286_v55 = vpop.permute.xlu1 %285 }
 0x1e3   :  { %556 = vpow2.f32 %v230_v54  ;;  %v242_v5 = vmul.f32 1.442695, %v227_v62  ;;  %vm308_vm12 = vcmp.eq.s32.totalorder %v687_v20, %v286_v55 }
 0x1e4   :  { %558 = vpow2.f32 %v240_v53  ;;  %v316_v16 = vsel %vm308_vm12, %v700_v30, 0.0  ;;  %v597_v30 = vmov 0.0   ;;  %vm347_vm12 = vcmp.ne.s32.totalorder %v663_v10, 4294967196 }
 0x1e5   :  { %560 = vpow2.f32 %v234_v56  ;;  %v473_v39 = vsel %vm343_vm8, 1.0, %v597_v30  ;;  %v474_v44 = vsel %vm344_vm9, 1.0, %v597_v30  ;;  %v475_v51 = vsel %vm345_vm10, 1.0, %v597_v30 }
 0x1e6   :  { %v551_v59 = vpop.eup %550  ;;  %v292_v60 = vpop.permute.xlu1 %291  ;;  %562 = vpow2.f32 %v238_v61  ;;  %v407_v42 = vsel %vm364_vm6, %v473_v39, 0.0  ;;  %v409_v47 = vsel %vm364_vm6, %v474_v44, 0.0  ;;  %v411_v53 = vsel %vm364_vm6, %v475_v51, 0.0 }
 0x1e7   :  { %244 = vadd.xlane.f32.xlu1 %v551_v59  ;;  %v553_v63 = vpop.eup %552  ;;  %564 = vpow2.f32 %v242_v5  ;;  %vm310_vm13 = vcmp.eq.s32.totalorder %v687_v20, %v292_v60  ;;  %v476_v55 = vsel %vm346_vm11, 1.0, %v597_v30  ;;  %v477_v60 = vsel %vm347_vm12, 1.0, %v597_v30 }
 0x1e8   :  { %v289_v18 = vpop.permute.xlu0 %288  ;;  %v318_v19 = vsel %vm310_vm13, %v697_v29, 0.0  ;;  %v413_v57 = vsel %vm364_vm6, %v476_v55, 0.0 }
 0x1e9   :  { %vm309_vm15 = vcmp.eq.s32.totalorder %v687_v20, %v289_v18 }
 0x1ea   :  { %v295_v2 = vpop.permute.xlu1 %294  ;;  %v317_v24 = vsel %vm309_vm15, %v717_v36, 0.0 }
 0x1eb   :  { %248 = vadd.xlane.f32.xlu1 %v553_v63  ;;  %vm311_vm1 = vcmp.eq.s32.totalorder %v687_v20, %v295_v2  ;;  %v415_v63 = vsel %vm364_vm6, %v477_v60, 0.0 }
 0x1ec   :  { %v555_v6 = vpop.eup %554  ;;  %v319_v26 = vsel %vm311_vm1, %v706_v32, 0.0  ;;  %v471_v32 = vsel %vm341_vm5, 1.0, %v597_v30 }
 0x1ee   :  { %v298_v12 = vpop.permute.xlu1 %297 }
 0x1ef   :  { %252 = vadd.xlane.f32.xlu1 %v555_v6  ;;  %vm312_vm14 = vcmp.eq.s32.totalorder %v687_v20, %v298_v12 }
 0x1f0   :  { %v557_v9 = vpop.eup %556  ;;  %v320_v23 = vsel %vm312_vm14, %v708_v33, 0.0  ;;  %v403_v33 = vsel %vm364_vm6, %v471_v32, 0.0 }
 0x1f1   :  { %246 = vadd.xlane.f32.xlu0 %v557_v9  ;;  %v559_v13 = vpop.eup %558 }
 0x1f2   :  { %v561_v14 = vpop.eup %560  ;;  %v301_v15 = vpop.permute.xlu1 %300 }
 0x1f3   :  { %256 = vadd.xlane.f32.xlu1 %v559_v13  ;;  %v563_v17 = vpop.eup %562  ;;  %vm313_vm2 = vcmp.eq.s32.totalorder %v687_v20, %v301_v15 }
 0x1f4   :  { %v565_v21 = vpop.eup %564  ;;  %v321_v28 = vsel %vm313_vm2, %v714_v35, 0.0 }
 0x1f5   :  { %250 = vadd.xlane.f32.xlu0 %v561_v14 }
 0x1f6   :  { %v304_v22 = vpop.permute.xlu1 %303 }
 0x1f7   :  { %324 = vadd.xlane.f32.xlu1 %v316_v16  ;;  %vm314_vm0 = vcmp.eq.s32.totalorder %v687_v20, %v304_v22 }
 0x1f8   :  { %v322_v25 = vsel %vm314_vm0, %v703_v31, 0.0  ;;  %v470_v31 = vsel %vm340_vm4, 1.0, %v597_v30 }
 0x1f9   :  { %254 = vadd.xlane.f32.xlu0 %v563_v17 }
 0x1fa   :  { %v307_v27 = vpop.permute.xlu1 %306 }
 0x1fb   :  { %328 = vadd.xlane.f32.xlu1 %v318_v19  ;;  %vm315_vm3 = vcmp.eq.s32.totalorder %v687_v20, %v307_v27  ;;  %v402_v20 = vsel %vm364_vm6, %v470_v31, 0.0 }
 0x1fc   :  { %v323_v29 = vsel %vm315_vm3, %v711_v34, 0.0  ;;  %v472_v34 = vsel %vm342_vm7, 1.0, %v597_v30  ;;  %v404_v35 = vadd.f32 %v403_v33, %v402_v20 }
 0x1fd   :  { %258 = vadd.xlane.f32.xlu0 %v565_v21  ;;  %v405_v36 = vsel %vm364_vm6, %v472_v34, 0.0 }
 0x1fe   :  { %v406_v40 = vadd.f32 %v405_v36, %v404_v35 }
 0x1ff   :  { %332 = vadd.xlane.f32.xlu1 %v320_v23 }
 0x200   :  { %v408_v46 = vadd.f32 %v407_v42, %v406_v40 }
 0x201   :  { %326 = vadd.xlane.f32.xlu0 %v317_v24 }
 0x202   :  { %v410_v52 = vadd.f32 %v409_v47, %v408_v46 }
 0x203   :  { %336 = vadd.xlane.f32.xlu1 %v322_v25 }
 0x204   :  { %v412_v56 = vadd.f32 %v411_v53, %v410_v52 }
 0x205   :  { %330 = vadd.xlane.f32.xlu0 %v319_v26 }
 0x206   :  { %v414_v62 = vadd.f32 %v413_v57, %v412_v56 }
 0x208   :  { %v416_v9 = vadd.f32 %v415_v63, %v414_v62 }
 0x209   :  { %334 = vadd.xlane.f32.xlu0 %v321_v28 }
 0x20a   :  { %v417_v16 = vrot.slane %v416_v9, 4 }
 0x20c   :  { %v418_v23 = vadd.f32 %v417_v16, %v416_v9 }
 0x20d   :  { %338 = vadd.xlane.f32.xlu0 %v323_v29 }
 0x20e   :  { %v419_v32 = vrot.slane %v418_v23, 2 }
 0x210   :  { %v420_v44 = vadd.f32 %v419_v32, %v418_v23 }
 0x212   :  { %v421_v57 = vrot.slane %v420_v44, 1 }
 0x214   :  { %v422_v8 = vadd.f32 %v421_v57, %v420_v44 }
 0x270   :  { %v245_v48 = vpop.xlane.xlu1 %244 }
 0x271   :  { %566 = vlog2.f32 %v245_v48 }
 0x274   :  { %v249_v54 = vpop.xlane.xlu1 %248 }
 0x275   :  { %568 = vlog2.f32 %v249_v54 }
 0x278   :  { %v253_v59 = vpop.xlane.xlu1 %252 }
 0x279   :  { %570 = vlog2.f32 %v253_v59 }
 0x27a   :  { %v247_v61 = vpop.xlane.xlu0 %246 }
 0x27b   :  { %572 = vlog2.f32 %v247_v61 }
 0x27c   :  { %v257_v2 = vpop.xlane.xlu1 %256 }
 0x27d   :  { %574 = vlog2.f32 %v257_v2 }
 0x27e   :  { %v567_v5 = vpop.eup %566  ;;  %v251_v6 = vpop.xlane.xlu0 %250 }
 0x27f   :  { %576 = vlog2.f32 %v251_v6  ;;  %v261_v13 = vmul.f32 0.6931472, %v567_v5 }
 0x280   :  { %v325_v12 = vpop.xlane.xlu1 %324 }
 0x281   :  { %v276_v18 = vadd.f32 %v261_v13, %v731_v38 }
 0x282   :  { %v569_v14 = vpop.eup %568  ;;  %v255_v15 = vpop.xlane.xlu0 %254 }
 0x283   :  { %v265_v17 = vmul.f32 0.6931472, %v569_v14  ;;  %578 = vlog2.f32 %v255_v15  ;;  %v348_v28 = vsub.f32 %v276_v18, %v325_v12 }
 0x284   :  { %v329_v21 = vpop.xlane.xlu1 %328 }
 0x285   :  { %v278_v25 = vadd.f32 %v265_v17, %v729_v37  ;;  %v356_v39 = vsel %vm340_vm4, %v348_v28, 0.0 }
 0x286   :  { %v571_v19 = vpop.eup %570  ;;  %v259_v22 = vpop.xlane.xlu0 %258  ;;  %v365_v51 = vsel %vm364_vm6, %v356_v39, 0.0 }
 0x287   :  { %v269_v24 = vmul.f32 0.6931472, %v571_v19  ;;  %580 = vlog2.f32 %v259_v22  ;;  %v350_v33 = vsub.f32 %v278_v25, %v329_v21 }
 0x288   :  { %v573_v26 = vpop.eup %572  ;;  %v333_v35 = vpop.xlane.xlu1 %332  ;;  %582 = vrcp.f32 %v422_v8 }
 0x289   :  { %v263_v27 = vmul.f32 0.6931472, %v573_v26  ;;  %v280_v30 = vadd.f32 %v269_v24, %v741_v45  ;;  %v358_v46 = vsel %vm342_vm7, %v350_v33, 0.0 }
 0x28a   :  { %v575_v29 = vpop.eup %574  ;;  %v327_v31 = vpop.xlane.xlu0 %326  ;;  %v368_v55 = vsel %vm364_vm6, %v358_v46, 0.0 }
 0x28b   :  { %v273_v20 = vmul.f32 0.6931472, %v575_v29  ;;  %v277_v38 = vadd.f32 %v263_v27, %v749_v50  ;;  %v352_v40 = vsub.f32 %v280_v30, %v333_v35 }
 0x28c   :  { %v577_v34 = vpop.eup %576  ;;  %v337_v56 = vpop.xlane.xlu1 %336 }
 0x28d   :  { %v267_v36 = vmul.f32 0.6931472, %v577_v34  ;;  %v349_v37 = vsub.f32 %v277_v38, %v327_v31  ;;  %v282_v47 = vadd.f32 %v273_v20, %v737_v41  ;;  %v360_v0 = vsel %vm344_vm9, %v352_v40, 0.0 }
 0x28e   :  { %v331_v42 = vpop.xlane.xlu0 %330  ;;  %v372_v6 = vsel %vm364_vm6, %v360_v0, 0.0 }
 0x28f   :  { %v357_v45 = vsel %vm341_vm5, %v349_v37, 0.0  ;;  %v279_v50 = vadd.f32 %v267_v36, %v739_v43  ;;  %v354_v59 = vsub.f32 %v282_v47, %v337_v56 }
 0x290   :  { %v579_v48 = vpop.eup %578  ;;  %v366_v1 = vsel %vm364_vm6, %v357_v45, 0.0 }
 0x291   :  { %v271_v52 = vmul.f32 0.6931472, %v579_v48  ;;  %v367_v53 = vadd.f32 %v366_v1, %v365_v51  ;;  %v351_v54 = vsub.f32 %v279_v50, %v331_v42  ;;  %v362_v9 = vsel %vm346_vm11, %v354_v59, 0.0 }
 0x292   :  { %v335_v4 = vpop.xlane.xlu0 %334  ;;  %v376_v17 = vsel %vm364_vm6, %v362_v9, 0.0 }
 0x293   :  { %v359_v41 = vsel %vm343_vm8, %v351_v54, 0.0  ;;  %v369_v43 = vadd.f32 %v368_v55, %v367_v53  ;;  %v281_v60 = vadd.f32 %v271_v52, %v747_v49 }
 0x294   :  { %v581_v61 = vpop.eup %580  ;;  %v370_v62 = vsel %vm364_vm6, %v359_v41, 0.0 }
 0x295   :  { %v275_v63 = vmul.f32 0.6931472, %v581_v61  ;;  %v371_v2 = vadd.f32 %v370_v62, %v369_v43  ;;  %v353_v5 = vsub.f32 %v281_v60, %v335_v4  ;;  %v583_v25 = vpop.eup %582 }
 0x296   :  { %v339_v14 = vpop.xlane.xlu0 %338 }
 0x297   :  { %v361_v12 = vsel %vm345_vm10, %v353_v5, 0.0  ;;  %v373_v3 = vadd.f32 %v372_v6, %v371_v2  ;;  %v283_v13 = vadd.f32 %v275_v63, %v757_v58 }
 0x298   :  { %v374_v49 = vsel %vm364_vm6, %v361_v12, 0.0 }
 0x299   :  { %v375_v15 = vadd.f32 %v374_v49, %v373_v3  ;;  %v355_v16 = vsub.f32 %v283_v13, %v339_v14 }
 0x29b   :  { %v363_v18 = vsel %vm347_vm12, %v355_v16, 0.0  ;;  %v377_v19 = vadd.f32 %v376_v17, %v375_v15 }
 0x29c   :  { %v378_v11 = vsel %vm364_vm6, %v363_v18, 0.0 }
 0x29d   :  { %v379_v21 = vadd.f32 %v378_v11, %v377_v19 }
 0x29f   :  { %v380_v7 = vrot.slane %v379_v21, 4 }
 0x2a1   :  { %v381_v22 = vadd.f32 %v380_v7, %v379_v21 }
 0x2a3   :  { %v382_v23 = vrot.slane %v381_v22, 2 }
 0x2a5   :  { %v383_v24 = vadd.f32 %v382_v23, %v381_v22 }
 0x2a7   :  { %v384_v58 = vrot.slane %v383_v24, 1 }
 0x2a9   :  { %v385_v26 = vadd.f32 %v384_v58, %v383_v24 }
 0x2ab   :  { %v424_v27 = vmul.f32 %v583_v25, %v385_v26 }
 0x2ad   :  { %427 = vrot.lane.b32.xlu1 %v424_v27, %s598_s1 }
 0x31f   :  { %v428_v28 = vpop.permute.xlu1 %427 }
 0x320   :  { %530 = vpush %v428_v28 }
 0x351   :  { %s531_s12 = spop %530 }
 0x352   :  { %432 = sst [smem:[#allocation2]] %s531_s12 }
 0x353   :  { %440 = dma.smem_to_hbm %s599_s13, 16, %s846_s2, [#allocation3]  }
 0x354   :  { %592 = dma.done.wait [#allocation3], 16  }
 0x355   :  { %593 = vsyncadd [#allocation3], 4294967280 }
 0x356   :  { %444 = sfence }
 0x357   :  { %445 = vsyncpa [#allocation3], 1 }

</bundles_post_ra>
